<compile_context>
chip_gen: v6e
topology: v6e:2x2x1
jax: 0.10.0
libtpu: 0.0.40
codegen_flags: <defaults>
</compile_context>

<pallas_src>
import functools

import jax
import jax.numpy as jnp
from jax import lax
from jax.experimental import pallas as pl
from jax.experimental.pallas import tpu as pltpu

EPS = 1e-5


# ----------------------------------------------------------------------------
# Pallas kernel: fused conv1+BN1+ReLU -> conv2+BN2 -> +residual -> ReLU
# ----------------------------------------------------------------------------
def _residual_conv2d_kernel(x_ref, b1_ref, s1_ref, c1_ref, b2_ref, s2_ref,
                            c2_ref, out_ref, xpad_ref, hpad_ref, *,
                            H, W, pad, dil, kH, Cin, Cmid, Cout):
  """One image per grid step, activations lane-packed as (H, W*C).

  x_ref  : (1, H, W*Cin)            input image, (w, c) packed on lanes
  b1_ref : (kH, Wp*Cin,  W*Cmid)    banded weights, stage 1
  s1/c1  : (1, W*Cmid)              folded BN scale / bias (pre-tiled)
  b2_ref : (kH, Wp*Cmid, W*Cout)    banded weights, stage 2
  s2/c2  : (1, W*Cout)
  out    : (1, H, W*Cout)
  xpad   : VMEM scratch (Hp, Wp*Cin)   zero-padded input
  hpad   : VMEM scratch (Hp, Wp*Cmid)  zero-padded intermediate activation
  """
  f32 = jnp.float32
  # Zero the padded scratch buffers each step (borders must be zero; interiors
  # are overwritten below).  ~10 KB of VPU stores per image: negligible, and
  # keeps the kernel correct when the batch axis is sharded across TensorCores.
  xpad_ref[...] = jnp.zeros_like(xpad_ref)
  hpad_ref[...] = jnp.zeros_like(hpad_ref)

  # ---- stage 1: conv1 + BN1 + ReLU (intermediate stays in VMEM) -----------
  xpad_ref[pl.ds(pad, H), pl.ds(pad * Cin, W * Cin)] = x_ref[0].astype(f32)
  acc1 = jnp.zeros((H, W * Cmid), f32)
  for kh in range(kH):  # small static tap loop: rows only, lane-dense matmuls
    acc1 += jnp.dot(xpad_ref[pl.ds(kh * dil, H), :], b1_ref[kh],
                    preferred_element_type=f32)
  h_act = jnp.maximum(acc1 * s1_ref[0] + c1_ref[0], 0.0)
  hpad_ref[pl.ds(pad, H), pl.ds(pad * Cmid, W * Cmid)] = h_act

  # ---- stage 2: conv2 + BN2 + residual + ReLU ------------------------------
  acc2 = jnp.zeros((H, W * Cout), f32)
  for kh in range(kH):
    acc2 += jnp.dot(hpad_ref[pl.ds(kh * dil, H), :], b2_ref[kh],
                    preferred_element_type=f32)
  y = acc2 * s2_ref[0] + c2_ref[0] + x_ref[0].astype(f32)   # residual add
  out_ref[0] = jnp.maximum(y, 0.0).astype(out_ref.dtype)


# ----------------------------------------------------------------------------
# Weight preprocessing: banded (block-Toeplitz) matrices for the packed layout
# ----------------------------------------------------------------------------
def _banded_weights(w_hwio, w_out, w_padded, dilation):
  """B[kh] of shape (Wp*Cin, Wout*Cout) such that, in the (W,C)-packed layout,
  conv(x)[h, w*Cout + co] = sum_kh xpad_row(h + kh*d) @ B[kh]."""
  kH, kW, cin, cout = w_hwio.shape
  win = jnp.arange(w_padded)[None, :, None]
  wo = jnp.arange(w_out)[None, None, :]
  kw = jnp.arange(kW)[:, None, None]
  ind = (win == wo + kw * dilation).astype(w_hwio.dtype)      # (kW, Wp, Wout)
  b = jnp.einsum('kaw,hkio->haiwo', ind, w_hwio)              # (kH,Wp,Cin,Wout,Cout)
  return b.reshape(kH, w_padded * cin, w_out * cout)


# ----------------------------------------------------------------------------
# ResidualConv2d forward (Pallas version)
# ----------------------------------------------------------------------------
def residual_conv2d_forward(x_nchw, params, *, padding, dilation):
  n, cin, h, w = x_nchw.shape
  cmid, _, kH, kW = params["w1"].shape
  cout = params["w2"].shape[0]
  ho = h + 2 * padding - dilation * (kH - 1)
  wo = w + 2 * padding - dilation * (kW - 1)
  if not (cin == cout and ho == h and wo == w):
    raise ValueError(
        "residual add requires Cin == Cout and 'same' conv geometry "
        f"(got Cin={cin}, Cout={cout}, H={h}->{ho}, W={w}->{wo})")
  hp, wp = h + 2 * padding, w + 2 * padding

  # Fold conv bias + eval-mode BN into per-channel scale/bias; pre-tile onto
  # the (W, C)-packed lane layout so the in-kernel epilogue is one FMA.
  s1 = params["gamma1"] / jnp.sqrt(params["var1"] + EPS)
  c1 = s1 * (params["cb1"] - params["mean1"]) + params["beta1"]
  s2 = params["gamma2"] / jnp.sqrt(params["var2"] + EPS)
  c2 = s2 * (params["cb2"] - params["mean2"]) + params["beta2"]
  s1p = jnp.tile(s1, w).reshape(1, w * cmid).astype(jnp.float32)
  c1p = jnp.tile(c1, w).reshape(1, w * cmid).astype(jnp.float32)
  s2p = jnp.tile(s2, w).reshape(1, w * cout).astype(jnp.float32)
  c2p = jnp.tile(c2, w).reshape(1, w * cout).astype(jnp.float32)

  w1 = jnp.transpose(params["w1"], (2, 3, 1, 0)).astype(jnp.float32)  # OIHW->HWIO
  w2 = jnp.transpose(params["w2"], (2, 3, 1, 0)).astype(jnp.float32)
  b1 = _banded_weights(w1, w, wp, dilation)   # (kH, wp*cin,  w*cmid)
  b2 = _banded_weights(w2, w, wp, dilation)   # (kH, wp*cmid, w*cout)

  # NCHW -> NHWC -> lane-packed (N, H, W*C); the reshape is a free view of the
  # contiguous NHWC buffer.
  x_packed = jnp.transpose(x_nchw, (0, 2, 3, 1)).reshape(n, h, w * cin)

  kern = functools.partial(_residual_conv2d_kernel, H=h, W=w, pad=padding,
                           dil=dilation, kH=kH, Cin=cin, Cmid=cmid, Cout=cout)

  out_packed = pl.pallas_call(
      kern,
      out_shape=jax.ShapeDtypeStruct((n, h, w * cout), x_nchw.dtype),
      grid=(n,),
      in_specs=[
          pl.BlockSpec((1, h, w * cin), lambda i: (i, 0, 0)),
          pl.BlockSpec((kH, wp * cin, w * cmid), lambda i: (0, 0, 0)),
          pl.BlockSpec((1, w * cmid), lambda i: (0, 0)),
          pl.BlockSpec((1, w * cmid), lambda i: (0, 0)),
          pl.BlockSpec((kH, wp * cmid, w * cout), lambda i: (0, 0, 0)),
          pl.BlockSpec((1, w * cout), lambda i: (0, 0)),
          pl.BlockSpec((1, w * cout), lambda i: (0, 0)),
      ],
      out_specs=pl.BlockSpec((1, h, w * cout), lambda i: (i, 0, 0)),
      scratch_shapes=[
          pltpu.VMEM((hp, wp * cin), jnp.float32),    # padded input
          pltpu.VMEM((hp, wp * cmid), jnp.float32),   # padded intermediate h
      ],
      compiler_params=pltpu.CompilerParams(
          dimension_semantics=("parallel",)),
  )(x_packed, b1, s1p, c1p, b2, s2p, c2p)

  out_nhwc = out_packed.reshape(n, h, w, cout)
  return jnp.transpose(out_nhwc, (0, 3, 1, 2))       # NHWC -> NCHW


# ----------------------------------------------------------------------------
# Pure-JAX reference (same eval-mode BN semantics) for verification
# ----------------------------------------------------------------------------
def residual_conv2d_reference(x_nchw, params, *, padding, dilation):
  def conv(x, w, b):
    y = lax.conv_general_dilated(
        x, w, window_strides=(1, 1),
        padding=[(padding, padding), (padding, padding)],
        rhs_dilation=(dilation, dilation),
        dimension_numbers=("NCHW", "OIHW", "NCHW"))
    return y + b[None, :, None, None]

  def bn(y, g, be, m, v):
    return (g[None, :, None, None] * (y - m[None, :, None, None]) /
            jnp.sqrt(v[None, :, None, None] + EPS) + be[None, :, None, None])

  h = conv(x_nchw, params["w1"], params["cb1"])
  h = jax.nn.relu(bn(h, params["gamma1"], params["beta1"], params["mean1"],
                     params["var1"]))
  o = conv(h, params["w2"], params["cb2"])
  o = bn(o, params["gamma2"], params["beta2"], params["mean2"],
         params["var2"])
  return jax.nn.relu(o + x_nchw)


def init_params(key, hidden_in, hidden_out, kernel):
  ks = jax.random.split(key, 12)
  f32 = jnp.float32
  return {
      "w1": 0.1 * jax.random.normal(ks[0], (hidden_out, hidden_in, kernel,
                                            kernel), f32),
      "cb1": 0.1 * jax.random.normal(ks[1], (hidden_out,), f32),
      "gamma1": jax.random.uniform(ks[2], (hidden_out,), f32, 0.5, 1.5),
      "beta1": 0.1 * jax.random.normal(ks[3], (hidden_out,), f32),
      "mean1": 0.1 * jax.random.normal(ks[4], (hidden_out,), f32),
      "var1": jax.random.uniform(ks[5], (hidden_out,), f32, 0.5, 1.5),
      "w2": 0.1 * jax.random.normal(ks[6], (hidden_out, hidden_out, kernel,
                                            kernel), f32),
      "cb2": 0.1 * jax.random.normal(ks[7], (hidden_out,), f32),
      "gamma2": jax.random.uniform(ks[8], (hidden_out,), f32, 0.5, 1.5),
      "beta2": 0.1 * jax.random.normal(ks[9], (hidden_out,), f32),
      "mean2": 0.1 * jax.random.normal(ks[10], (hidden_out,), f32),
      "var2": jax.random.uniform(ks[11], (hidden_out,), f32, 0.5, 1.5),
  }


if __name__ == "__main__":
  # Residual add requires hidden_in == hidden_out and 'same' padding geometry.
  N, C, H, W = 2, 4, 16, 16
  KERNEL, PADDING, DILATION = 3, 1, 1

  key = jax.random.PRNGKey(0)
  kx, kp = jax.random.split(key)
  x = jax.random.normal(kx, (N, C, H, W), jnp.float32)
  params = init_params(kp, C, C, KERNEL)

  out = residual_conv2d_forward(x, params, padding=PADDING, dilation=DILATION)
  out = jax.block_until_ready(out)

  ref = residual_conv2d_reference(x, params, padding=PADDING,
                                  dilation=DILATION)
  assert out.shape == (N, C, H, W)
  assert jnp.allclose(out, ref, atol=1e-4, rtol=1e-4), (
      float(jnp.max(jnp.abs(out - ref))))
  print("KERNEL_OK")
</pallas_src>

<mosaic_0001>
module attributes {stable_mosaic.version = 11 : i64} {
  func.func @_residual_conv2d_kernel(%arg0: i32, %arg1: memref<1x16x64xf32, #tpu.memory_space<vmem>>, %arg2: memref<3x72x64xf32, #tpu.memory_space<vmem>>, %arg3: memref<1x64xf32, #tpu.memory_space<vmem>>, %arg4: memref<1x64xf32, #tpu.memory_space<vmem>>, %arg5: memref<3x72x64xf32, #tpu.memory_space<vmem>>, %arg6: memref<1x64xf32, #tpu.memory_space<vmem>>, %arg7: memref<1x64xf32, #tpu.memory_space<vmem>>, %arg8: memref<1x16x64xf32, #tpu.memory_space<vmem>>, %arg9: memref<18x72xf32, #tpu.memory_space<vmem>>, %arg10: memref<18x72xf32, #tpu.memory_space<vmem>>) attributes {dimension_semantics = [#tpu.dimension_semantics<parallel>], iteration_bounds = array<i64: 2>, scalar_prefetch = 0 : i64, scratch_operands = 2 : i64, tpu.core_type = #tpu.core_type<tc>, window_params = [{transform_indices = @transform_0, window_bounds = array<i64: 1, 16, 64>}, {pipeline_mode = #tpu.pipeline_mode<synchronous>, transform_indices = @transform_1, window_bounds = array<i64: 3, 72, 64>}, {pipeline_mode = #tpu.pipeline_mode<synchronous>, transform_indices = @transform_2, window_bounds = array<i64: 1, 64>}, {pipeline_mode = #tpu.pipeline_mode<synchronous>, transform_indices = @transform_3, window_bounds = array<i64: 1, 64>}, {pipeline_mode = #tpu.pipeline_mode<synchronous>, transform_indices = @transform_4, window_bounds = array<i64: 3, 72, 64>}, {pipeline_mode = #tpu.pipeline_mode<synchronous>, transform_indices = @transform_5, window_bounds = array<i64: 1, 64>}, {pipeline_mode = #tpu.pipeline_mode<synchronous>, transform_indices = @transform_6, window_bounds = array<i64: 1, 64>}, {transform_indices = @transform_7, window_bounds = array<i64: 1, 16, 64>}]} {
    %cst = arith.constant 0.000000e+00 : f32
    %0 = vector.broadcast %cst : f32 to vector<18x72xf32>
    %c0 = arith.constant 0 : index
    %c0_0 = arith.constant 0 : index
    %1 = vector.load %arg9[%c0, %c0_0] : memref<18x72xf32, #tpu.memory_space<vmem>>, vector<18x72xf32>
    tpu.vector_store %arg9[%c0, %c0_0], %0 {strides = array<i32>} : memref<18x72xf32, #tpu.memory_space<vmem>>, vector<18x72xf32>,
    %cst_1 = arith.constant 0.000000e+00 : f32
    %2 = vector.broadcast %cst_1 : f32 to vector<18x72xf32>
    %c0_2 = arith.constant 0 : index
    %c0_3 = arith.constant 0 : index
    %3 = vector.load %arg10[%c0_2, %c0_3] : memref<18x72xf32, #tpu.memory_space<vmem>>, vector<18x72xf32>
    tpu.vector_store %arg10[%c0_2, %c0_3], %2 {strides = array<i32>} : memref<18x72xf32, #tpu.memory_space<vmem>>, vector<18x72xf32>,
    %c0_4 = arith.constant 0 : index
    %c0_5 = arith.constant 0 : index
    %c0_6 = arith.constant 0 : index
    %4 = vector.load %arg1[%c0_4, %c0_5, %c0_6] : memref<1x16x64xf32, #tpu.memory_space<vmem>>, vector<1x16x64xf32>
    %5 = vector.shape_cast %4 : vector<1x16x64xf32> to vector<16x64xf32>
    %c1 = arith.constant 1 : index
    %c4 = arith.constant 4 : index
    %6 = vector.load %arg9[%c1, %c4] : memref<18x72xf32, #tpu.memory_space<vmem>>, vector<16x64xf32>
    tpu.vector_store %arg9[%c1, %c4], %5 {strides = array<i32>} : memref<18x72xf32, #tpu.memory_space<vmem>>, vector<16x64xf32>,
    %cst_7 = arith.constant 0.000000e+00 : f32
    %7 = vector.broadcast %cst_7 : f32 to vector<16x64xf32>
    %c0_8 = arith.constant 0 : index
    %c0_9 = arith.constant 0 : index
    %8 = vector.load %arg9[%c0_8, %c0_9] : memref<18x72xf32, #tpu.memory_space<vmem>>, vector<16x72xf32>
    %c0_10 = arith.constant 0 : index
    %c0_11 = arith.constant 0 : index
    %c0_12 = arith.constant 0 : index
    %9 = vector.load %arg2[%c0_10, %c0_11, %c0_12] : memref<3x72x64xf32, #tpu.memory_space<vmem>>, vector<1x72x64xf32>
    %10 = vector.shape_cast %9 : vector<1x72x64xf32> to vector<72x64xf32>
    %cst_13 = arith.constant dense<0.000000e+00> : vector<16x64xf32>
    %11 = tpu.matmul %8, %10, %cst_13 {dimension_numbers = #tpu.dot_dimension_numbers<[1], [0], [0], [1], [0, 0, 1, 1], [], []>} : vector<16x72xf32>, vector<72x64xf32>, vector<16x64xf32> -> vector<16x64xf32>
    %12 = arith.addf %7, %11 : vector<16x64xf32>
    %c1_14 = arith.constant 1 : index
    %c0_15 = arith.constant 0 : index
    %13 = vector.load %arg9[%c1_14, %c0_15] : memref<18x72xf32, #tpu.memory_space<vmem>>, vector<16x72xf32>
    %c1_16 = arith.constant 1 : index
    %c0_17 = arith.constant 0 : index
    %c0_18 = arith.constant 0 : index
    %14 = vector.load %arg2[%c1_16, %c0_17, %c0_18] : memref<3x72x64xf32, #tpu.memory_space<vmem>>, vector<1x72x64xf32>
    %15 = vector.shape_cast %14 : vector<1x72x64xf32> to vector<72x64xf32>
    %cst_19 = arith.constant dense<0.000000e+00> : vector<16x64xf32>
    %16 = tpu.matmul %13, %15, %cst_19 {dimension_numbers = #tpu.dot_dimension_numbers<[1], [0], [0], [1], [0, 0, 1, 1], [], []>} : vector<16x72xf32>, vector<72x64xf32>, vector<16x64xf32> -> vector<16x64xf32>
    %17 = arith.addf %12, %16 : vector<16x64xf32>
    %c2 = arith.constant 2 : index
    %c0_20 = arith.constant 0 : index
    %18 = vector.load %arg9[%c2, %c0_20] : memref<18x72xf32, #tpu.memory_space<vmem>>, vector<16x72xf32>
    %c2_21 = arith.constant 2 : index
    %c0_22 = arith.constant 0 : index
    %c0_23 = arith.constant 0 : index
    %19 = vector.load %arg2[%c2_21, %c0_22, %c0_23] : memref<3x72x64xf32, #tpu.memory_space<vmem>>, vector<1x72x64xf32>
    %20 = vector.shape_cast %19 : vector<1x72x64xf32> to vector<72x64xf32>
    %cst_24 = arith.constant dense<0.000000e+00> : vector<16x64xf32>
    %21 = tpu.matmul %18, %20, %cst_24 {dimension_numbers = #tpu.dot_dimension_numbers<[1], [0], [0], [1], [0, 0, 1, 1], [], []>} : vector<16x72xf32>, vector<72x64xf32>, vector<16x64xf32> -> vector<16x64xf32>
    %22 = arith.addf %17, %21 : vector<16x64xf32>
    %c0_25 = arith.constant 0 : index
    %c0_26 = arith.constant 0 : index
    %23 = vector.load %arg3[%c0_25, %c0_26] : memref<1x64xf32, #tpu.memory_space<vmem>>, vector<1x64xf32>
    %24 = vector.shape_cast %23 : vector<1x64xf32> to vector<64xf32>
    %25 = vector.shape_cast %24 : vector<64xf32> to vector<1x64xf32>
    %26 = vector.broadcast %25 : vector<1x64xf32> to vector<16x64xf32>
    %27 = arith.mulf %22, %26 : vector<16x64xf32>
    %c0_27 = arith.constant 0 : index
    %c0_28 = arith.constant 0 : index
    %28 = vector.load %arg4[%c0_27, %c0_28] : memref<1x64xf32, #tpu.memory_space<vmem>>, vector<1x64xf32>
    %29 = vector.shape_cast %28 : vector<1x64xf32> to vector<64xf32>
    %30 = vector.shape_cast %29 : vector<64xf32> to vector<1x64xf32>
    %31 = vector.broadcast %30 : vector<1x64xf32> to vector<16x64xf32>
    %32 = arith.addf %27, %31 : vector<16x64xf32>
    %cst_29 = arith.constant 0.000000e+00 : f32
    %33 = vector.broadcast %cst_29 : f32 to vector<16x64xf32>
    %34 = arith.maximumf %32, %33 : vector<16x64xf32>
    %c1_30 = arith.constant 1 : index
    %c4_31 = arith.constant 4 : index
    %35 = vector.load %arg10[%c1_30, %c4_31] : memref<18x72xf32, #tpu.memory_space<vmem>>, vector<16x64xf32>
    tpu.vector_store %arg10[%c1_30, %c4_31], %34 {strides = array<i32>} : memref<18x72xf32, #tpu.memory_space<vmem>>, vector<16x64xf32>,
    %cst_32 = arith.constant 0.000000e+00 : f32
    %36 = vector.broadcast %cst_32 : f32 to vector<16x64xf32>
    %c0_33 = arith.constant 0 : index
    %c0_34 = arith.constant 0 : index
    %37 = vector.load %arg10[%c0_33, %c0_34] : memref<18x72xf32, #tpu.memory_space<vmem>>, vector<16x72xf32>
    %c0_35 = arith.constant 0 : index
    %c0_36 = arith.constant 0 : index
    %c0_37 = arith.constant 0 : index
    %38 = vector.load %arg5[%c0_35, %c0_36, %c0_37] : memref<3x72x64xf32, #tpu.memory_space<vmem>>, vector<1x72x64xf32>
    %39 = vector.shape_cast %38 : vector<1x72x64xf32> to vector<72x64xf32>
    %cst_38 = arith.constant dense<0.000000e+00> : vector<16x64xf32>
    %40 = tpu.matmul %37, %39, %cst_38 {dimension_numbers = #tpu.dot_dimension_numbers<[1], [0], [0], [1], [0, 0, 1, 1], [], []>} : vector<16x72xf32>, vector<72x64xf32>, vector<16x64xf32> -> vector<16x64xf32>
    %41 = arith.addf %36, %40 : vector<16x64xf32>
    %c1_39 = arith.constant 1 : index
    %c0_40 = arith.constant 0 : index
    %42 = vector.load %arg10[%c1_39, %c0_40] : memref<18x72xf32, #tpu.memory_space<vmem>>, vector<16x72xf32>
    %c1_41 = arith.constant 1 : index
    %c0_42 = arith.constant 0 : index
    %c0_43 = arith.constant 0 : index
    %43 = vector.load %arg5[%c1_41, %c0_42, %c0_43] : memref<3x72x64xf32, #tpu.memory_space<vmem>>, vector<1x72x64xf32>
    %44 = vector.shape_cast %43 : vector<1x72x64xf32> to vector<72x64xf32>
    %cst_44 = arith.constant dense<0.000000e+00> : vector<16x64xf32>
    %45 = tpu.matmul %42, %44, %cst_44 {dimension_numbers = #tpu.dot_dimension_numbers<[1], [0], [0], [1], [0, 0, 1, 1], [], []>} : vector<16x72xf32>, vector<72x64xf32>, vector<16x64xf32> -> vector<16x64xf32>
    %46 = arith.addf %41, %45 : vector<16x64xf32>
    %c2_45 = arith.constant 2 : index
    %c0_46 = arith.constant 0 : index
    %47 = vector.load %arg10[%c2_45, %c0_46] : memref<18x72xf32, #tpu.memory_space<vmem>>, vector<16x72xf32>
    %c2_47 = arith.constant 2 : index
    %c0_48 = arith.constant 0 : index
    %c0_49 = arith.constant 0 : index
    %48 = vector.load %arg5[%c2_47, %c0_48, %c0_49] : memref<3x72x64xf32, #tpu.memory_space<vmem>>, vector<1x72x64xf32>
    %49 = vector.shape_cast %48 : vector<1x72x64xf32> to vector<72x64xf32>
    %cst_50 = arith.constant dense<0.000000e+00> : vector<16x64xf32>
    %50 = tpu.matmul %47, %49, %cst_50 {dimension_numbers = #tpu.dot_dimension_numbers<[1], [0], [0], [1], [0, 0, 1, 1], [], []>} : vector<16x72xf32>, vector<72x64xf32>, vector<16x64xf32> -> vector<16x64xf32>
    %51 = arith.addf %46, %50 : vector<16x64xf32>
    %c0_51 = arith.constant 0 : index
    %c0_52 = arith.constant 0 : index
    %52 = vector.load %arg6[%c0_51, %c0_52] : memref<1x64xf32, #tpu.memory_space<vmem>>, vector<1x64xf32>
    %53 = vector.shape_cast %52 : vector<1x64xf32> to vector<64xf32>
    %54 = vector.shape_cast %53 : vector<64xf32> to vector<1x64xf32>
    %55 = vector.broadcast %54 : vector<1x64xf32> to vector<16x64xf32>
    %56 = arith.mulf %51, %55 : vector<16x64xf32>
    %c0_53 = arith.constant 0 : index
    %c0_54 = arith.constant 0 : index
    %57 = vector.load %arg7[%c0_53, %c0_54] : memref<1x64xf32, #tpu.memory_space<vmem>>, vector<1x64xf32>
    %58 = vector.shape_cast %57 : vector<1x64xf32> to vector<64xf32>
    %59 = vector.shape_cast %58 : vector<64xf32> to vector<1x64xf32>
    %60 = vector.broadcast %59 : vector<1x64xf32> to vector<16x64xf32>
    %61 = arith.addf %56, %60 : vector<16x64xf32>
    %c0_55 = arith.constant 0 : index
    %c0_56 = arith.constant 0 : index
    %c0_57 = arith.constant 0 : index
    %62 = vector.load %arg1[%c0_55, %c0_56, %c0_57] : memref<1x16x64xf32, #tpu.memory_space<vmem>>, vector<1x16x64xf32>
    %63 = vector.shape_cast %62 : vector<1x16x64xf32> to vector<16x64xf32>
    %64 = arith.addf %61, %63 : vector<16x64xf32>
    %cst_58 = arith.constant 0.000000e+00 : f32
    %65 = vector.broadcast %cst_58 : f32 to vector<16x64xf32>
    %66 = arith.maximumf %64, %65 : vector<16x64xf32>
    %c0_59 = arith.constant 0 : index
    %c0_60 = arith.constant 0 : index
    %c0_61 = arith.constant 0 : index
    %67 = vector.load %arg8[%c0_59, %c0_60, %c0_61] : memref<1x16x64xf32, #tpu.memory_space<vmem>>, vector<1x16x64xf32>
    %68 = vector.shape_cast %67 : vector<1x16x64xf32> to vector<16x64xf32>
    %69 = vector.shape_cast %66 : vector<16x64xf32> to vector<1x16x64xf32>
    tpu.vector_store %arg8[%c0_59, %c0_60, %c0_61], %69 {strides = array<i32>} : memref<1x16x64xf32, #tpu.memory_space<vmem>>, vector<1x16x64xf32>,
    return
  }
  func.func @transform_0(%arg0: i32) -> (i32, i32, i32) {
    %c0_i32 = arith.constant 0 : i32
    %c0_i32_0 = arith.constant 0 : i32
    %c0_i32_1 = arith.constant 0 : i32
    return %arg0, %c0_i32, %c0_i32_0 : i32, i32, i32
  }
  func.func @transform_1(%arg0: i32) -> (i32, i32, i32) {
    %c0_i32 = arith.constant 0 : i32
    %c0_i32_0 = arith.constant 0 : i32
    %c0_i32_1 = arith.constant 0 : i32
    %c0_i32_2 = arith.constant 0 : i32
    return %c0_i32, %c0_i32_0, %c0_i32_1 : i32, i32, i32
  }
  func.func @transform_2(%arg0: i32) -> (i32, i32) {
    %c0_i32 = arith.constant 0 : i32
    %c0_i32_0 = arith.constant 0 : i32
    %c0_i32_1 = arith.constant 0 : i32
    return %c0_i32, %c0_i32_0 : i32, i32
  }
  func.func @transform_3(%arg0: i32) -> (i32, i32) {
    %c0_i32 = arith.constant 0 : i32
    %c0_i32_0 = arith.constant 0 : i32
    %c0_i32_1 = arith.constant 0 : i32
    return %c0_i32, %c0_i32_0 : i32, i32
  }
  func.func @transform_4(%arg0: i32) -> (i32, i32, i32) {
    %c0_i32 = arith.constant 0 : i32
    %c0_i32_0 = arith.constant 0 : i32
    %c0_i32_1 = arith.constant 0 : i32
    %c0_i32_2 = arith.constant 0 : i32
    return %c0_i32, %c0_i32_0, %c0_i32_1 : i32, i32, i32
  }
  func.func @transform_5(%arg0: i32) -> (i32, i32) {
    %c0_i32 = arith.constant 0 : i32
    %c0_i32_0 = arith.constant 0 : i32
    %c0_i32_1 = arith.constant 0 : i32
    return %c0_i32, %c0_i32_0 : i32, i32
  }
  func.func @transform_6(%arg0: i32) -> (i32, i32) {
    %c0_i32 = arith.constant 0 : i32
    %c0_i32_0 = arith.constant 0 : i32
    %c0_i32_1 = arith.constant 0 : i32
    return %c0_i32, %c0_i32_0 : i32, i32
  }
  func.func @transform_7(%arg0: i32) -> (i32, i32, i32) {
    %c0_i32 = arith.constant 0 : i32
    %c0_i32_0 = arith.constant 0 : i32
    %c0_i32_1 = arith.constant 0 : i32
    return %arg0, %c0_i32, %c0_i32_0 : i32, i32, i32
  }
}

</mosaic_0001>

<bundles_post_ra>
// kernel: tpu_custom_call.1
= control target key start
LH: loop header
LB: loop body
LE: loop exit
PB: predicated region body
PF: predicated region fallthrough
CT: control target
= control target key end

     0   :  { %12 = vsyncpa [#allocation5], 0  ;;  %s1707_s0 = inlined_call_operand.vmem [shape: f32[2,16,64], index: 0, kind: input, shape index: {}]   ;;  %s1708_s1 = inlined_call_operand.vmem [shape: f32[3,72,64], index: 1, kind: input, shape index: {}]   ;;  %s1709_s2 = inlined_call_operand.vmem [shape: f32[1,64], index: 2, kind: input, shape index: {}]   ;;  %s1710_s3 = inlined_call_operand.vmem [shape: f32[1,64], index: 3, kind: input, shape index: {}]   ;;  %s1711_s4 = inlined_call_operand.vmem [shape: f32[3,72,64], index: 4, kind: input, shape index: {}]   ;;  %s1712_s5 = inlined_call_operand.vmem [shape: f32[1,64], index: 5, kind: input, shape index: {}]   ;;  %s1713_s6 = inlined_call_operand.vmem [shape: f32[1,64], index: 6, kind: input, shape index: {}]   ;;  %s1714_s7 = inlined_call_operand.hbm [shape: f32[2,16,64], index: 7, kind: output, shape index: {}]  }
   0x1   :  { %14 = vsyncpa [#allocation5 + $0x1], 0  ;;  %s1399_s24 = smov 0   ;;  %s1401_s25 = smov 0  }
   0x2   :  { %s1403_s26 = smov 0   ;;  %s1405_s27 = smov 0  }
   0x3 LB: > { %s1420_s28 = sadd.s32 4294967295, %s1352_s27   ;;  %s991_s29 = sadd.s32 4294967294, %s1352_s27   ;;  %s1352_s27 = sphi %s1405_s27, %s1720_s27   ;;  %s1348_s26 = sphi %s1403_s26, %s1719_s26   ;;  %s1344_s25 = sphi %s1401_s25, %s1718_s25   ;;  %s1340_s24 = sphi %s1399_s24, %s1717_s24  }
   0x4   : > { %s1424_s30 = sadd.s32 1, %s1352_s27   ;;  %s179_s8 = sadd.s32 1, %s1348_s26 }
   0x5   : > { %s176_s9 = ssub.s32 %s1352_s27, %s1424_s30  ;;  %p189_p0 = scmp.ne.s32.totalorder %s1348_s26, %s1344_s25 }
   0x6   : > { %p177_p1 = scmp.eq.s32.totalorder %s176_s9, 0  ;;  %p190_p2 = scmp.eq.s32.totalorder %s1420_s28, 1 }
   0x7   : > { %p195_p3 = scmp.ne.s32.totalorder %s1344_s25, %s1340_s24  ;;  %p196_p4 = scmp.eq.s32.totalorder %s991_s29, 1 }
   0x8   : > { %s1435_s10 = scalar_select %p177_p1, %s1348_s26, %s179_s8  }
   0x9   : > { %p1437_p5 = por %p190_p2, %p189_p0  ;;  %p1441_p6 = por %p196_p4, %p195_p3 }
   0xa   : > { %p994_p7 = scmp.ge.s32.totalorder %s1352_s27, 1  ;;  %p240_p8 = scmp.lt.s32.totalorder %s1352_s27, 3 }
   0xc   : > { %p241_p9 = pnand %p994_p7, %p240_p8 }
   0xd   : > { %p272_p10 = scmp.lt.s32.totalorder (!%p241_p9), %s1420_s28, 1  ;;  %s1355_s22 = smov (!%p241_p9), 4  }
   0xe   : > { %244 = sbr.rel (%p241_p9) target bundleno = 738 (0x2e2), region = 48  ;;  %s1056_s16 = sshll.u32 (!%p241_p9), %s1420_s28, 8 }
   0xf   : > { %s1356_s29 = smov (!%p241_p9), [#allocation4]  }
  0x10   : > { %s1296_s8 = sshll.u32 (!%p241_p9), %s1356_s29, 4  ;;  %s1297_s8 = int_to_ptr.vmem [resolvable:$false] %s1296_s8 }
  0x13   : > { %v1006_v0 = vld [vmem:[%s1708_s1 + $0x88] sm:$0xff]  ;;  %v308_v1 = vld [vmem:[%s1708_s1 + $0x40] sm:$0xff]  ;;  %vm277_vm0 = vcmask 588800   ;;  %v307_v3 = vld [vmem:[%s1708_s1 + $0x38] sm:$0xff]  ;;  %vm280_vm1 = vcmask 582656   ;;  %s273_s21 = scalar_select %p272_p10, %s1420_s28, 1 }
  0x14   : > { %v1005_v2 = vld [vmem:[%s1708_s1 + $0x80] sm:$0xff]  ;;  %1123 = vmatprep.subr.mxu0 %v1006_v0  ;;  %1144 = vmatprep.subr.mxu1 %v308_v1  ;;  %v1004_v4 = vld [vmem:[%s1708_s1 + $0x78] sm:$0xff]  ;;  %v306_v5 = vld [vmem:[%s1708_s1 + $0x30] sm:$0xff]  ;;  %v1354_v6 = vmov 0.0   ;;  %vm295_vm2 = vcmask 556064   ;;  %vm912_vm3 = vcmask 523264  }
  0x15   : > { %1124 = vmatpush3.msra.mxu0 %v1006_v0  ;;  %1145 = vmatpush3.msra.mxu1 %v308_v1  ;;  %278 = vst.msk [vmem:[#allocation2] sm:$0xff] %vm277_vm0, %v1354_v6  ;;  %279 = vst.msk [vmem:[#allocation2 + $0x8] sm:$0xff] %vm277_vm0, %v1354_v6  ;;  %s1055_s9 = sshll.u32 %s273_s21, 4  ;;  %v1003_v7 = vld [vmem:[%s1708_s1 + $0x70] sm:$0xff]  ;;  %v305_v8 = vld [vmem:[%s1708_s1 + $0x28] sm:$0xff]  ;;  %s1663_s21 = scalar_lea.hbm %s1714_s7, %s1056_s16 }
  0x16   : > { %282 = vst.msk [vmem:[#allocation3] sm:$0xff] %vm277_vm0, %v1354_v6  ;;  %283 = vst.msk [vmem:[#allocation3 + $0x8] sm:$0xff] %vm277_vm0, %v1354_v6  ;;  %1125 = vmatprep.subr.mxu0 %v1005_v2  ;;  %1146 = vmatprep.subr.mxu1 %v307_v3  ;;  %s276_s17 = scalar_lea.vmem %s1707_s0, %s1055_s9  ;;  %v1002_v10 = vld [vmem:[%s1708_s1 + $0x68] sm:$0xff]  ;;  %v304_v11 = vld [vmem:[%s1708_s1 + $0x20] sm:$0xff]  ;;  %s1298_s9 = scalar_lea.vmem %s1297_s8, 512 }
  0x17   : > { %281 = vst.msk [vmem:[#allocation2 + $0x10] sm:$0x3] %vm280_vm1, %v1354_v6  ;;  %284 = vst.msk [vmem:[#allocation3 + $0x10] sm:$0x3] %vm280_vm1, %v1354_v6  ;;  %1126 = vmatpush3.msra.mxu0 %v1005_v2  ;;  %1147 = vmatpush3.msra.mxu1 %v307_v3  ;;  %v1480_v9 = vld [vmem:[%s276_s17] sm:$0xff]  ;;  %v1490_v12 = vld [vmem:[%s276_s17 + $0x8] sm:$0xff] }
  0x18   : > { %1127 = vmatprep.subr.mxu0 %v1004_v4  ;;  %1148 = vmatprep.subr.mxu1 %v306_v5  ;;  %v1001_v13 = vld [vmem:[%s1708_s1 + $0x60] sm:$0xff]  ;;  %v303_v14 = vld [vmem:[%s1708_s1 + $0x18] sm:$0xff]  ;;  %v302_v16 = vld [vmem:[%s1708_s1 + $0x10] sm:$0xff] }
  0x19   : > { %1128 = vmatpush3.msra.mxu0 %v1004_v4  ;;  %1149 = vmatpush3.msra.mxu1 %v306_v5  ;;  %v1000_v15 = vld [vmem:[%s1708_s1 + $0x58] sm:$0xff]  ;;  %v999_v17 = vld [vmem:[%s1708_s1 + $0x50] sm:$0xff]  ;;  %v301_v18 = vld [vmem:[%s1708_s1 + $0x8] sm:$0xff] }
  0x1a   : > { %289 = vrot.lane.b32.xlu0 %v1480_v9, %s1355_s22  ;;  %1129 = vmatprep.subr.mxu0 %v1003_v7  ;;  %v998_v19 = vld [vmem:[%s1708_s1 + $0x48] sm:$0xff]  ;;  %v300_v20 = vld [vmem:[%s1708_s1] sm:$0xff]  ;;  %v1019_v21 = vld [vmem:[%s1708_s1 + $0xd0] sm:$0xff] }
  0x1b   : > { %1130 = vmatpush3.msra.mxu0 %v1003_v7  ;;  %1150 = vmatprep.subr.mxu1 %v305_v8  ;;  %v1018_v26 = vld [vmem:[%s1708_s1 + $0xc8] sm:$0xff]  ;;  %v1017_v30 = vld [vmem:[%s1708_s1 + $0xc0] sm:$0xff]  ;;  %v1016_v31 = vld [vmem:[%s1708_s1 + $0xb8] sm:$0xff] }
  0x1c   : > { %1131 = vmatprep.subr.mxu0 %v1002_v10  ;;  %1151 = vmatpush3.msra.mxu1 %v305_v8  ;;  %v1015_v32 = vld [vmem:[%s1708_s1 + $0xb0] sm:$0xff]  ;;  %v1014_v33 = vld [vmem:[%s1708_s1 + $0xa8] sm:$0xff]  ;;  %v1013_v34 = vld [vmem:[%s1708_s1 + $0xa0] sm:$0xff] }
  0x1d   : > { %1132 = vmatpush3.msra.mxu0 %v1002_v10  ;;  %1152 = vmatprep.subr.mxu1 %v304_v11  ;;  %v1012_v35 = vld [vmem:[%s1708_s1 + $0x98] sm:$0xff]  ;;  %v1011_v36 = vld [vmem:[%s1708_s1 + $0x90] sm:$0xff]  ;;  %v1032_v38 = vld [vmem:[%s1711_s4 + $0x88] sm:$0xff] }
  0x1e   : > { %291 = vrot.lane.b32.xlu0 %v1490_v12, %s1355_s22  ;;  %1133 = vmatprep.subr.mxu0 %v1001_v13  ;;  %v618_v39 = vld [vmem:[%s1711_s4 + $0x40] sm:$0xff]  ;;  %v617_v41 = vld [vmem:[%s1711_s4 + $0x38] sm:$0xff]  ;;  %v616_v43 = vld [vmem:[%s1711_s4 + $0x30] sm:$0xff] }
  0x1f   : > { %1153 = vmatpush3.msra.mxu1 %v304_v11  ;;  %1134 = vmatpush3.msra.mxu0 %v1001_v13  ;;  %v1031_v40 = vld [vmem:[%s1711_s4 + $0x80] sm:$0xff]  ;;  %v1030_v42 = vld [vmem:[%s1711_s4 + $0x78] sm:$0xff]  ;;  %v1029_v44 = vld [vmem:[%s1711_s4 + $0x70] sm:$0xff] }
  0x20   : > { %1154 = vmatprep.subr.mxu1 %v303_v14  ;;  %1135 = vmatprep.subr.mxu0 %v1000_v15  ;;  %v615_v47 = vld [vmem:[%s1711_s4 + $0x28] sm:$0xff]  ;;  %v614_v51 = vld [vmem:[%s1711_s4 + $0x20] sm:$0xff]  ;;  %v613_v58 = vld [vmem:[%s1711_s4 + $0x18] sm:$0xff] }
  0x21   : > { %1155 = vmatpush3.msra.mxu1 %v303_v14  ;;  %1136 = vmatpush3.msra.mxu0 %v1000_v15  ;;  %v1028_v50 = vld [vmem:[%s1711_s4 + $0x68] sm:$0xff]  ;;  %v1027_v52 = vld [vmem:[%s1711_s4 + $0x60] sm:$0xff]  ;;  %v1026_v60 = vld [vmem:[%s1711_s4 + $0x58] sm:$0xff] }
  0x22   : > { %1156 = vmatprep.subr.mxu1 %v302_v16  ;;  %1137 = vmatprep.subr.mxu0 %v999_v17  ;;  %v1022_v57 = vld [vmem:[%s1709_s2] ss:$0 sm:$0xff]  ;;  %v612_v61 = vld [vmem:[%s1711_s4 + $0x10] sm:$0xff]  ;;  %v611_v3 = vld [vmem:[%s1711_s4 + $0x8] sm:$0xff] }
  0x23   : > { %1157 = vmatpush3.msra.mxu1 %v302_v16  ;;  %1138 = vmatpush3.msra.mxu0 %v999_v17  ;;  %v1025_v62 = vld [vmem:[%s1711_s4 + $0x50] sm:$0xff]  ;;  %v1023_v2 = vld [vmem:[%s1710_s3] ss:$0 sm:$0xff]  ;;  %v1024_v4 = vld [vmem:[%s1711_s4 + $0x48] sm:$0xff] }
  0x24   : > { %1158 = vmatprep.subr.mxu1 %v301_v18  ;;  %1139 = vmatprep.subr.mxu0 %v998_v19  ;;  %v610_v5 = vld [vmem:[%s1711_s4] sm:$0xff]  ;;  %v1045_v6 = vld [vmem:[%s1711_s4 + $0xd0] sm:$0xff]  ;;  %v1044_v17 = vld [vmem:[%s1711_s4 + $0xc8] sm:$0xff] }
  0x25   : > { %1159 = vmatpush3.msra.mxu1 %v301_v18  ;;  %1140 = vmatpush3.msra.mxu0 %v998_v19 }
  0x26   : > { %1160 = vmatprep.subr.mxu1 %v300_v20  ;;  %1165 = vmatprep.subr.mxu0 %v1019_v21 }
  0x27   : > { %1161 = vmatpush3.msra.mxu1 %v300_v20 }
  0x28   : > { %1186 = vmatprep.subr.mxu1 %v1032_v38 }
  0x8c   : > { %v290_v22 = vpop.permute.xlu0 %289 }
  0x8d   : > { %296 = vst.msk [vmem:[#allocation2 + $0x1] sm:$0xff] %vm295_vm2, %v290_v22  ;;  %v1042_v22 = vld [vmem:[%s1711_s4 + $0xb8] sm:$0xff] }
  0x90   : > { %v292_v23 = vpop.permute.xlu0 %291 }
  0x91   : > { %297 = vst.msk [vmem:[#allocation2 + $0x9] sm:$0xff] %vm295_vm2, %v292_v23  ;;  %v1041_v23 = vld [vmem:[%s1711_s4 + $0xb0] sm:$0xff] }
  0x94   : > { %v309_v24 = vld [vmem:[#allocation2 + $0x1] sm:$0xff] }
  0x95   : > { %v298_v25 = vld [vmem:[#allocation2] sm:$0xff]  ;;  %1141 = vmatprep.mubr.msk.f32.mxu0 %vm277_vm0, %v309_v24  ;;  %v1040_v24 = vld [vmem:[%s1711_s4 + $0xa8] sm:$0xff] }
  0x96   : > { %1162 = vmatprep.mubr.msk.f32.mxu1 %vm277_vm0, %v298_v25  ;;  %v1039_v25 = vld [vmem:[%s1711_s4 + $0xa0] sm:$0xff] }
  0x98   : > { %v310_v27 = vld [vmem:[#allocation2 + $0x9] sm:$0xff] }
  0x99   : > { %v299_v28 = vld [vmem:[#allocation2 + $0x8] sm:$0xff]  ;;  %1142 = vmatmul.mubr.msk.f32.vlgmr.msra.gmra.mxu0 %vm277_vm0, %v310_v27  ;;  %v1037_v27 = vld [vmem:[%s1711_s4 + $0x90] sm:$0xff] }
  0x9a   : > { %v483_v29 = vld [vmem:[#allocation2 + $0x2] sm:$0xff]  ;;  %1163 = vmatmul.mubr.msk.f32.vlgmr.msra.gmra.mxu1 %vm277_vm0, %v299_v28  ;;  %1166 = vmatpush3.msra.mxu0 %v1019_v21  ;;  %v484_v37 = vld [vmem:[#allocation2 + $0xa] sm:$0xff] }
  0x9b   : > { %1183 = vmatprep.mubr.msk.f32.mxu0 %vm277_vm0, %v483_v29  ;;  %1167 = vmatprep.subr.mxu0 %v1018_v26  ;;  %v1043_v21 = vld [vmem:[%s1711_s4 + $0xc0] sm:$0xff] }
  0x9c   : > { %1168 = vmatpush3.msra.mxu0 %v1018_v26  ;;  %1187 = vmatpush3.msra.mxu1 %v1032_v38  ;;  %v1038_v26 = vld [vmem:[%s1711_s4 + $0x98] sm:$0xff]  ;;  %v1049_v38 = vld [vmem:[%s1713_s6] ss:$0 sm:$0xff] }
  0x9d   : > { %1169 = vmatprep.subr.mxu0 %v1017_v30  ;;  %1188 = vmatprep.subr.mxu1 %v1031_v40 }
  0x9e   : > { %1170 = vmatpush3.msra.mxu0 %v1017_v30  ;;  %1189 = vmatpush3.msra.mxu1 %v1031_v40 }
  0x9f   : > { %1171 = vmatprep.subr.mxu0 %v1016_v31  ;;  %1190 = vmatprep.subr.mxu1 %v1030_v42 }
  0xa0   : > { %1172 = vmatpush3.msra.mxu0 %v1016_v31  ;;  %1191 = vmatpush3.msra.mxu1 %v1030_v42 }
  0xa1   : > { %1173 = vmatprep.subr.mxu0 %v1015_v32  ;;  %1192 = vmatprep.subr.mxu1 %v1029_v44 }
  0xa2   : > { %1174 = vmatpush3.msra.mxu0 %v1015_v32  ;;  %1193 = vmatpush3.msra.mxu1 %v1029_v44 }
  0xa3   : > { %1175 = vmatprep.subr.mxu0 %v1014_v33  ;;  %1194 = vmatprep.subr.mxu1 %v1028_v50 }
  0xa4   : > { %1176 = vmatpush3.msra.mxu0 %v1014_v33  ;;  %1195 = vmatpush3.msra.mxu1 %v1028_v50 }
  0xa5   : > { %1177 = vmatprep.subr.mxu0 %v1013_v34  ;;  %1196 = vmatprep.subr.mxu1 %v1027_v52 }
  0xa6   : > { %1178 = vmatpush3.msra.mxu0 %v1013_v34  ;;  %1197 = vmatpush3.msra.mxu1 %v1027_v52 }
  0xa7   : > { %1179 = vmatprep.subr.mxu0 %v1012_v35  ;;  %1198 = vmatprep.subr.mxu1 %v1026_v60 }
  0xa8   : > { %1180 = vmatpush3.msra.mxu0 %v1012_v35  ;;  %1199 = vmatpush3.msra.mxu1 %v1026_v60  ;;  %v1048_v35 = vld [vmem:[%s1712_s5] ss:$0 sm:$0xff] }
  0xa9   : > { %1181 = vmatprep.subr.mxu0 %v1011_v36  ;;  %1200 = vmatprep.subr.mxu1 %v1025_v62 }
  0xaa   : > { %1182 = vmatpush3.msra.mxu0 %v1011_v36  ;;  %1201 = vmatpush3.msra.mxu1 %v1025_v62 }
  0xab   : > { %1184 = vmatmul.mubr.msk.f32.vlgmr.msra.gmra.mxu0 %vm277_vm0, %v484_v37  ;;  %1207 = vmatprep.subr.mxu0 %v618_v39 }
  0xac   : > { %1208 = vmatpush3.msra.mxu0 %v618_v39  ;;  %1202 = vmatprep.subr.mxu1 %v1024_v4 }
  0xad   : > { %1209 = vmatprep.subr.mxu0 %v617_v41  ;;  %1203 = vmatpush3.msra.mxu1 %v1024_v4 }
  0xae   : > { %1210 = vmatpush3.msra.mxu0 %v617_v41  ;;  %1228 = vmatprep.subr.mxu1 %v1045_v6 }
  0xaf   : > { %1211 = vmatprep.subr.mxu0 %v616_v43 }
  0xb0   : > { %1212 = vmatpush3.msra.mxu0 %v616_v43 }
  0xb1   : > { %1213 = vmatprep.subr.mxu0 %v615_v47 }
  0xb2   : > { %1214 = vmatpush3.msra.mxu0 %v615_v47 }
  0xb3   : > { %1215 = vmatprep.subr.mxu0 %v614_v51 }
  0xb4   : > { %1216 = vmatpush3.msra.mxu0 %v614_v51 }
  0xb5   : > { %1217 = vmatprep.subr.mxu0 %v613_v58 }
  0xb6   : > { %1218 = vmatpush3.msra.mxu0 %v613_v58 }
  0xb7   : > { %1219 = vmatprep.subr.mxu0 %v612_v61 }
  0xb8   : > { %1220 = vmatpush3.msra.mxu0 %v612_v61 }
  0xb9   : > { %1221 = vmatprep.subr.mxu0 %v611_v3 }
  0xba   : > { %1222 = vmatpush3.msra.mxu0 %v611_v3 }
  0xbb   : > { %1223 = vmatprep.subr.mxu0 %v610_v5 }
  0xbc   : > { %1224 = vmatpush3.msra.mxu0 %v610_v5 }
 0x159   : > { %v1143_v45 = vpop.f32.mrf.mxu0 }
 0x15a   : > { %v1164_v46 = vpop.f32.mrf.mxu1 }
 0x15b   : > { %v393_v48 = vpop.f32.mrf.mxu0  ;;  %v480_v53 = vadd.f32 %v1164_v46, %v1143_v45 }
 0x15c   : > { %v474_v49 = vpop.f32.mrf.mxu1 }
 0x15d   : > { %v475_v55 = vadd.f32 %v474_v49, %v393_v48 }
 0x16b   : > { %v1185_v54 = vpop.f32.mrf.mxu0 }
 0x16c   : > { %v577_v56 = vadd.f32 %v1185_v54, %v480_v53 }
 0x16d   : > { %v567_v59 = vpop.f32.mrf.mxu0 }
 0x16e   : > { %v576_v63 = vadd.f32 %v567_v59, %v475_v55  ;;  %v586_v0 = vmul.f32 %v1022_v57, %v577_v56 }
 0x170   : > { %v585_v1 = vmul.f32 %v1022_v57, %v576_v63  ;;  %v595_v8 = vadd.f32 %v1023_v2, %v586_v0 }
 0x172   : > { %v594_v7 = vadd.f32 %v1023_v2, %v585_v1  ;;  %v597_v11 = vmax.f32 %v595_v8, 0.0 }
 0x174   : > { %v596_v10 = vmax.f32 %v594_v7, 0.0 }
 0x176   : > { %600 = vrot.lane.b32.xlu1 %v596_v10, %s1355_s22 }
 0x17a   : > { %602 = vrot.lane.b32.xlu1 %v597_v11, %s1355_s22  ;;  %s269_s22 = sand.u32 1, %s1344_s25  }
 0x17b   : > { %s995_s13 = sshll.u32 %s269_s22, 4  ;;  %s1667_s28 = scalar_lea.sflag [#allocation5], %s269_s22 }
 0x17c   : > { %s271_s17 = scalar_lea.vmem [#allocation4], %s995_s13 }
 0x17d   : > { %s929_s18 = sshll.u32 %s271_s17, 4  ;;  %s1665_s18 = int_to_ptr.vmem [resolvable:$true] %s929_s18 }
 0x17e   : > { %s1292_s23 = scalar_lea.vmem %s1665_s18, 256  ;;  %p1299_p0 = scmp.lt.s32.totalorder %s1665_s18, %s1297_s8 }
 0x17f   : > { %p1293_p11 = scmp.ne.s32.totalorder %s1665_s18, %s1292_s23  ;;  %p1300_p1 = scmp.lt.s32.totalorder %s1298_s9, %s1292_s23 }
 0x181   : > { %p1294_p12 = pnand %p1293_p11, %p1437_p5  ;;  %p1301_p2 = por %p1300_p1, %p1299_p0 }
 0x183   : > { %p1295_p13 = pneg %p1294_p12 }
 0x185   : > { %p1302_p3 = pnand %p1301_p2, %p1295_p13 }
 0x1e8   : > { %v601_v13 = vpop.permute.xlu1 %600 }
 0x1e9   : > { %606 = vst.msk [vmem:[#allocation3 + $0x1] sm:$0xff] %vm295_vm2, %v601_v13 }
 0x1ec   : > { %v603_v14 = vpop.permute.xlu1 %602 }
 0x1ed   : > { %607 = vst.msk [vmem:[#allocation3 + $0x9] sm:$0xff] %vm295_vm2, %v603_v14 }
 0x1f0   : > { %v619_v15 = vld [vmem:[#allocation3 + $0x1] sm:$0xff] }
 0x1f1   : > { %v608_v16 = vld [vmem:[#allocation3] sm:$0xff]  ;;  %1204 = vmatprep.mubr.msk.f32.mxu1 %vm277_vm0, %v619_v15 }
 0x1f2   : > { %1225 = vmatprep.mubr.msk.f32.mxu0 %vm277_vm0, %v608_v16 }
 0x1f4   : > { %v620_v18 = vld [vmem:[#allocation3 + $0x9] sm:$0xff] }
 0x1f5   : > { %v609_v19 = vld [vmem:[#allocation3 + $0x8] sm:$0xff]  ;;  %1205 = vmatmul.mubr.msk.f32.vlgmr.msra.gmra.mxu1 %vm277_vm0, %v620_v18 }
 0x1f6   : > { %v793_v20 = vld [vmem:[#allocation3 + $0x2] sm:$0xff]  ;;  %1226 = vmatmul.mubr.msk.f32.vlgmr.msra.gmra.mxu0 %vm277_vm0, %v609_v19  ;;  %1229 = vmatpush3.msra.mxu1 %v1045_v6  ;;  %v794_v28 = vld [vmem:[#allocation3 + $0xa] sm:$0xff] }
 0x1f7   : > { %1246 = vmatprep.mubr.msk.f32.mxu1 %vm277_vm0, %v793_v20  ;;  %1230 = vmatprep.subr.mxu1 %v1044_v17 }
 0x1f8   : > { %1231 = vmatpush3.msra.mxu1 %v1044_v17 }
 0x1f9   : > { %1232 = vmatprep.subr.mxu1 %v1043_v21 }
 0x1fa   : > { %1233 = vmatpush3.msra.mxu1 %v1043_v21 }
 0x1fb   : > { %1234 = vmatprep.subr.mxu1 %v1042_v22 }
 0x1fc   : > { %1235 = vmatpush3.msra.mxu1 %v1042_v22 }
 0x1fd   : > { %1236 = vmatprep.subr.mxu1 %v1041_v23 }
 0x1fe   : > { %1237 = vmatpush3.msra.mxu1 %v1041_v23 }
 0x1ff   : > { %1238 = vmatprep.subr.mxu1 %v1040_v24 }
 0x200   : > { %1239 = vmatpush3.msra.mxu1 %v1040_v24 }
 0x201   : > { %1240 = vmatprep.subr.mxu1 %v1039_v25 }
 0x202   : > { %1241 = vmatpush3.msra.mxu1 %v1039_v25 }
 0x203   : > { %1242 = vmatprep.subr.mxu1 %v1038_v26 }
 0x204   : > { %1243 = vmatpush3.msra.mxu1 %v1038_v26 }
 0x205   : > { %1244 = vmatprep.subr.mxu1 %v1037_v27 }
 0x206   : > { %1245 = vmatpush3.msra.mxu1 %v1037_v27 }
 0x207   : > { %1247 = vmatmul.mubr.msk.f32.vlgmr.msra.gmra.mxu1 %vm277_vm0, %v794_v28 }
 0x2b5   : > { %v1206_v29 = vpop.f32.mrf.mxu1 }
 0x2b6   : > { %v1227_v30 = vpop.f32.mrf.mxu0 }
 0x2b7   : > { %v703_v31 = vpop.f32.mrf.mxu1  ;;  %v790_v33 = vadd.f32 %v1227_v30, %v1206_v29 }
 0x2b8   : > { %v784_v32 = vpop.f32.mrf.mxu0 }
 0x2b9   : > { %v785_v36 = vadd.f32 %v784_v32, %v703_v31 }
 0x2c7   : > { %v1248_v34 = vpop.f32.mrf.mxu1 }
 0x2c8   : > { %v887_v37 = vadd.f32 %v1248_v34, %v790_v33 }
 0x2c9   : > { %v877_v39 = vpop.f32.mrf.mxu1 }
 0x2ca   : > { %v896_v40 = vmul.f32 %v1048_v35, %v887_v37  ;;  %v886_v41 = vadd.f32 %v877_v39, %v785_v36 }
 0x2cc   : > { %v905_v42 = vadd.f32 %v1049_v38, %v896_v40  ;;  %v895_v43 = vmul.f32 %v1048_v35, %v886_v41 }
 0x2ce   : > { %v909_v44 = vadd.f32 %v905_v42, %v1490_v12  ;;  %v904_v45 = vadd.f32 %v1049_v38, %v895_v43 }
 0x2d0   : > { %v911_v46 = vmax.f32 %v909_v44, 0.0  ;;  %v908_v47 = vadd.f32 %v904_v45, %v1480_v9 }
 0x2d2   : > { %914 = vst.msk [vmem:[%s271_s17 + $0x8] sm:$0xff] %vm912_vm3, %v911_v46  ;;  %v910_v12 = vmax.f32 %v908_v47, 0.0 }
 0x2d4   : > { %913 = vst.msk [vmem:[%s271_s17] sm:$0xff] %vm912_vm3, %v910_v12 }
 0x2d5   : > { %1305 = shalt.err (!%p1302_p3)
}
 0x2d6   : > { %s1306_s22 = scalar_lea.hbm %s1663_s21, 256  ;;  %s1310_s15 = scalar_lea.hbm %s1714_s7, 512 }
 0x2d7   : > { %p1307_p4 = scmp.ne.s32.totalorder %s1663_s21, %s1306_s22  ;;  %p1311_p9 = scmp.lt.s32.totalorder %s1663_s21, %s1714_s7 }
 0x2d8   : > { %p1312_p10 = scmp.lt.s32.totalorder %s1310_s15, %s1306_s22 }
 0x2d9   : > { %p1308_p7 = pnand %p1307_p4, %p1437_p5 }
 0x2da   : > { %p1313_p11 = por %p1312_p10, %p1311_p9 }
 0x2db   : > { %p1309_p8 = pneg %p1308_p7 }
 0x2dd   : > { %p1314_p12 = pnand %p1313_p11, %p1309_p8 }
 0x2df   : > { %1317 = shalt.err (!%p1314_p12)
}
 0x2e0   : > { %s1357_s19 = smov 128   ;;  %s1358_s20 = smov 8  }
 0x2e1   : > { %1249 = dma.vmem_to_hbm [thread:$0]  (%p1437_p5), %s1665_s18, 256, %s1663_s21, %s1667_s28, %s1357_s19, %s1357_s19, %s1358_s20  }
 0x2e2 PF: > { %p1255_p13 = scmp.ge.s32.totalorder %s1352_s27, 2  ;;  %s944_s23 = sand.u32 1, %s1340_s24  }
 0x2e3   : > { %s945_s29 = scalar_lea.sflag [#allocation5], %s944_s23 }
 0x2e4   : > { %p1252_p0 = pnand %p1255_p13, %p1441_p6 }
 0x2e6   : > { %p1253_p1 = pneg %p1252_p0 }
 0x2e8   : > { %1335 = dma.done.wait (%p1253_p1), %s945_s29, 256  }
 0x2e9   : > { %1337 = vsyncadd (%p1253_p1), %s945_s29, 4294967040  ;;  %p17_p2 = scmp.ge.s32.totalorder %s1424_s30, 4   ;;  %s1717_s24 = smov %s1344_s25 }
 0x2ea   : > { %s1718_s25 = smov %s1348_s26  ;;  %s1719_s26 = smov %s1435_s10 }
 0x2eb   : > { %s1720_s27 = smov %s1424_s30  ;;  %19 = sbr.rel (!%p17_p2) target bundleno = 3 (0x3), region = 87 }
 0x2f0   :  { %950 = vsyncpa [#allocation5], 1 }
 0x2f1   :  { %952 = vsyncpa [#allocation5 + $0x1], 1 }

</bundles_post_ra>
